<compile_context>
chip_gen: v7x
topology: tpu7x:2x2x1
jax: 0.10.0
libtpu: 0.0.40
codegen_flags: <defaults>
</compile_context>

<pallas_src>
import functools

import jax
import jax.numpy as jnp
from jax.experimental import pallas as pl
from jax.experimental.pallas import tpu as pltpu


def cross_attention_kernel(x_ref, xcls_ref, wq_ref, wk_ref, wv_ref, wo_ref,
                           bo_ref, o_ref, *, batch_tile, seq_len, heads,
                           dim_head, scale):
    Bt, N = batch_tile, seq_len
    inner = heads * dim_head

    x_rows = x_ref[...]        # (Bt*N, DIM) bf16 -- all tokens of this batch tile
    x_cls = xcls_ref[...]      # (Bt,   DIM) bf16 -- CLS token of each batch element

    # --- Projections: wide bf16 MXU matmuls, f32 accumulation. ---
    k = jnp.dot(x_rows, wk_ref[...], preferred_element_type=jnp.float32)  # (Bt*N, INNER)
    v = jnp.dot(x_rows, wv_ref[...], preferred_element_type=jnp.float32)  # (Bt*N, INNER)
    q = jnp.dot(x_cls, wq_ref[...], preferred_element_type=jnp.float32)   # (Bt,   INNER)
    q = q * scale

    # One-hot head-segment matrices (which head each of the INNER lanes belongs to).
    i_idx = jax.lax.broadcasted_iota(jnp.int32, (inner, heads), 0)
    h_idx = jax.lax.broadcasted_iota(jnp.int32, (inner, heads), 1)
    seg = ((i_idx >= h_idx * dim_head) &
           (i_idx < (h_idx + 1) * dim_head)).astype(jnp.float32)          # (INNER, heads)
    i_t = jax.lax.broadcasted_iota(jnp.int32, (heads, inner), 1)
    h_t = jax.lax.broadcasted_iota(jnp.int32, (heads, inner), 0)
    seg_t = ((i_t >= h_t * dim_head) &
             (i_t < (h_t + 1) * dim_head)).astype(jnp.float32)            # (heads, INNER)

    # --- Per-head logits: dots[b, j, h] = sum_{d in head h} q[b, :] * k[b, j, :]. ---
    k3 = k.reshape(Bt, N, inner)
    v3 = v.reshape(Bt, N, inner)
    t = q[:, None, :] * k3                                    # (Bt, N, INNER)  VPU
    dots = jnp.dot(t.reshape(Bt * N, inner), seg,
                   preferred_element_type=jnp.float32)        # (Bt*N, heads)
    dots = dots.reshape(Bt, N, heads)

    # --- Softmax over keys (axis=1), numerically stable, f32. ---
    m = jnp.max(dots, axis=1, keepdims=True)                  # (Bt, 1, heads)
    e = jnp.exp(dots - m)                                     # (Bt, N, heads)
    denom = jnp.sum(e, axis=1, keepdims=True)                 # (Bt, 1, heads)
    attn = e * pl.reciprocal(denom, approx=True)              # (Bt, N, heads)

    # --- Weighted sum of V: expand attn over each head's lanes, reduce over keys. ---
    attn_full = jnp.dot(attn.reshape(Bt * N, heads), seg_t,
                        preferred_element_type=jnp.float32)   # (Bt*N, INNER)
    ctx = jnp.sum(attn_full.reshape(Bt, N, inner) * v3, axis=1)   # (Bt, INNER)

    # --- Output projection (nn.Linear(inner_dim, dim)); dropout p=0.0 -> identity. ---
    out = jnp.dot(ctx.astype(wo_ref.dtype), wo_ref[...],
                  preferred_element_type=jnp.float32) + bo_ref[...]
    o_ref[...] = out.astype(o_ref.dtype)                      # (Bt, DIM) dense store


def _choose_batch_tiling(B, N):
    """Sublane-aligned batch tile + number of grid steps.

    Aims for >=256 rows (batch_tile * N) per projection matmul (fills the
    256-wide MXU on v6e/v7x; >=128 already fine on v5e) while keeping at least
    two 'parallel' grid steps when B > 1 so both v7x TensorCores get work.
    """
    target_rows = 256
    bt = max(1, min(pl.cdiv(B, 2), pl.cdiv(target_rows, N)))
    bt = ((bt + 7) // 8) * 8              # multiple of 8 -> aligned sublane blocks
    num_tiles = pl.cdiv(B, bt)
    if B > 1:
        num_tiles = max(num_tiles, 2)
    return bt, num_tiles


def cross_attention(x, wq, wk, wv, wo, bo, *, heads, dim_head):
    B, N, DIM = x.shape
    INNER = heads * dim_head
    scale = dim_head ** -0.5

    Bt, num_tiles = _choose_batch_tiling(B, N)
    Bp = Bt * num_tiles

    # bf16 operands for the MXU; accumulation stays f32 inside the kernel.
    cdt = jnp.bfloat16
    xc = x.astype(cdt)
    if Bp != B:
        xc = jnp.pad(xc, ((0, Bp - B), (0, 0), (0, 0)))   # padded batches -> discarded
    x_flat = xc.reshape(Bp * N, DIM)     # tokens of batch b live in rows [b*N, (b+1)*N)
    x_cls = xc[:, 0, :]                  # (Bp, DIM) CLS token per batch element

    bo2 = bo.reshape(1, DIM).astype(jnp.float32)

    kernel = functools.partial(
        cross_attention_kernel, batch_tile=Bt, seq_len=N, heads=heads,
        dim_head=dim_head, scale=scale)

    out2d = pl.pallas_call(
        kernel,
        out_shape=jax.ShapeDtypeStruct((Bp, DIM), x.dtype),
        grid_spec=pltpu.PrefetchScalarGridSpec(
            num_scalar_prefetch=0,
            grid=(num_tiles,),
            in_specs=[
                pl.BlockSpec((Bt * N, DIM), lambda g: (g, 0)),   # token rows
                pl.BlockSpec((Bt, DIM), lambda g: (g, 0)),       # CLS rows
                pl.BlockSpec((DIM, INNER), lambda g: (0, 0)),    # Wq
                pl.BlockSpec((DIM, INNER), lambda g: (0, 0)),    # Wk
                pl.BlockSpec((DIM, INNER), lambda g: (0, 0)),    # Wv
                pl.BlockSpec((INNER, DIM), lambda g: (0, 0)),    # Wo
                pl.BlockSpec((1, DIM), lambda g: (0, 0)),        # bo
            ],
            out_specs=pl.BlockSpec((Bt, DIM), lambda g: (g, 0)),
        ),
        compiler_params=pltpu.CompilerParams(
            dimension_semantics=("parallel",)),
        # NOTE: at real ViT shapes re-derive Bt against v7x's 64 MiB VMEM and set
        # vmem_limit_bytes explicitly; at these shapes the defaults are ample.
    )(x_flat, x_cls, wq.astype(cdt), wk.astype(cdt), wv.astype(cdt),
      wo.astype(cdt), bo2)

    return out2d[:B].reshape(B, 1, DIM)


def cross_attention_ref(x, wq, wk, wv, wo, bo, *, heads, dim_head):
    """Pure-JAX f32 reference matching the PyTorch forward."""
    B, N, DIM = x.shape
    scale = dim_head ** -0.5
    k = x @ wk                                    # (B, N, INNER)
    v = x @ wv
    q = x[:, 0:1, :] @ wq                         # (B, 1, INNER)
    k = k.reshape(B, N, heads, dim_head).transpose(0, 2, 1, 3)
    v = v.reshape(B, N, heads, dim_head).transpose(0, 2, 1, 3)
    q = q.reshape(B, 1, heads, dim_head).transpose(0, 2, 1, 3)
    dots = jnp.einsum('bhid,bhjd->bhij', q, k) * scale
    attn = jax.nn.softmax(dots, axis=-1)
    out = jnp.einsum('bhij,bhjd->bhid', attn, v)
    out = out.transpose(0, 2, 1, 3).reshape(B, 1, heads * dim_head)
    return out @ wo + bo


if __name__ == "__main__":
    # Small shapes consistent with the module.
    B, N, DIM = 2, 8, 32
    HEADS, DIM_HEAD = 4, 16
    INNER = HEADS * DIM_HEAD

    key = jax.random.PRNGKey(0)
    kx, kq, kk, kv, ko, kb = jax.random.split(key, 6)

    x = jax.random.normal(kx, (B, N, DIM), dtype=jnp.float32)
    wq = jax.random.normal(kq, (DIM, INNER), dtype=jnp.float32) * 0.05
    wk = jax.random.normal(kk, (DIM, INNER), dtype=jnp.float32) * 0.05
    wv = jax.random.normal(kv, (DIM, INNER), dtype=jnp.float32) * 0.05
    wo = jax.random.normal(ko, (INNER, DIM), dtype=jnp.float32) * 0.05
    bo = jax.random.normal(kb, (DIM,), dtype=jnp.float32) * 0.05

    out = cross_attention(x, wq, wk, wv, wo, bo, heads=HEADS, dim_head=DIM_HEAD)
    out = jax.block_until_ready(out)

    ref = cross_attention_ref(x, wq, wk, wv, wo, bo, heads=HEADS, dim_head=DIM_HEAD)
    assert out.shape == (B, 1, DIM)
    # bf16 MXU operands + approx reciprocal -> looser tolerance than pure f32.
    assert jnp.allclose(out, ref, atol=2e-2, rtol=2e-2), "mismatch vs reference"

    print("KERNEL_OK")
</pallas_src>

<mosaic_0001>
module attributes {stable_mosaic.version = 11 : i64} {
  func.func @cross_attention_kernel(%arg0: i32, %arg1: memref<64x32xbf16, #tpu.memory_space<vmem>>, %arg2: memref<8x32xbf16, #tpu.memory_space<vmem>>, %arg3: memref<32x64xbf16, #tpu.memory_space<vmem>>, %arg4: memref<32x64xbf16, #tpu.memory_space<vmem>>, %arg5: memref<32x64xbf16, #tpu.memory_space<vmem>>, %arg6: memref<64x32xbf16, #tpu.memory_space<vmem>>, %arg7: memref<1x32xf32, #tpu.memory_space<vmem>>, %arg8: memref<8x32xf32, #tpu.memory_space<vmem>>) attributes {dimension_semantics = [#tpu.dimension_semantics<parallel>], iteration_bounds = array<i64: 2>, scalar_prefetch = 0 : i64, scratch_operands = 0 : i64, tpu.core_type = #tpu.core_type<tc>, window_params = [{transform_indices = @transform_0, window_bounds = array<i64: 64, 32>}, {transform_indices = @transform_1, window_bounds = array<i64: 8, 32>}, {pipeline_mode = #tpu.pipeline_mode<synchronous>, transform_indices = @transform_2, window_bounds = array<i64: 32, 64>}, {pipeline_mode = #tpu.pipeline_mode<synchronous>, transform_indices = @transform_3, window_bounds = array<i64: 32, 64>}, {pipeline_mode = #tpu.pipeline_mode<synchronous>, transform_indices = @transform_4, window_bounds = array<i64: 32, 64>}, {pipeline_mode = #tpu.pipeline_mode<synchronous>, transform_indices = @transform_5, window_bounds = array<i64: 64, 32>}, {pipeline_mode = #tpu.pipeline_mode<synchronous>, transform_indices = @transform_6, window_bounds = array<i64: 1, 32>}, {transform_indices = @transform_7, window_bounds = array<i64: 8, 32>}]} {
    %c0 = arith.constant 0 : index
    %c0_0 = arith.constant 0 : index
    %0 = vector.load %arg1[%c0, %c0_0] : memref<64x32xbf16, #tpu.memory_space<vmem>>, vector<64x32xbf16>
    %c0_1 = arith.constant 0 : index
    %c0_2 = arith.constant 0 : index
    %1 = vector.load %arg2[%c0_1, %c0_2] : memref<8x32xbf16, #tpu.memory_space<vmem>>, vector<8x32xbf16>
    %c0_3 = arith.constant 0 : index
    %c0_4 = arith.constant 0 : index
    %2 = vector.load %arg4[%c0_3, %c0_4] : memref<32x64xbf16, #tpu.memory_space<vmem>>, vector<32x64xbf16>
    %cst = arith.constant dense<0.000000e+00> : vector<64x64xf32>
    %3 = tpu.matmul %0, %2, %cst {dimension_numbers = #tpu.dot_dimension_numbers<[1], [0], [0], [1], [0, 0, 1, 1], [], []>} : vector<64x32xbf16>, vector<32x64xbf16>, vector<64x64xf32> -> vector<64x64xf32>
    %c0_5 = arith.constant 0 : index
    %c0_6 = arith.constant 0 : index
    %4 = vector.load %arg5[%c0_5, %c0_6] : memref<32x64xbf16, #tpu.memory_space<vmem>>, vector<32x64xbf16>
    %cst_7 = arith.constant dense<0.000000e+00> : vector<64x64xf32>
    %5 = tpu.matmul %0, %4, %cst_7 {dimension_numbers = #tpu.dot_dimension_numbers<[1], [0], [0], [1], [0, 0, 1, 1], [], []>} : vector<64x32xbf16>, vector<32x64xbf16>, vector<64x64xf32> -> vector<64x64xf32>
    %c0_8 = arith.constant 0 : index
    %c0_9 = arith.constant 0 : index
    %6 = vector.load %arg3[%c0_8, %c0_9] : memref<32x64xbf16, #tpu.memory_space<vmem>>, vector<32x64xbf16>
    %cst_10 = arith.constant dense<0.000000e+00> : vector<8x64xf32>
    %7 = tpu.matmul %1, %6, %cst_10 {dimension_numbers = #tpu.dot_dimension_numbers<[1], [0], [0], [1], [0, 0, 1, 1], [], []>} : vector<8x32xbf16>, vector<32x64xbf16>, vector<8x64xf32> -> vector<8x64xf32>
    %cst_11 = arith.constant 2.500000e-01 : f32
    %8 = vector.broadcast %cst_11 : f32 to vector<8x64xf32>
    %9 = arith.mulf %7, %8 : vector<8x64xf32>
    %10 = tpu.iota {dimensions = array<i32: 0>} : vector<64x4xi32>
    %11 = tpu.iota {dimensions = array<i32: 1>} : vector<64x4xi32>
    %c16_i32 = arith.constant 16 : i32
    %12 = vector.broadcast %c16_i32 : i32 to vector<64x4xi32>
    %13 = arith.muli %11, %12 : vector<64x4xi32>
    %14 = arith.cmpi sge, %10, %13 : vector<64x4xi32>
    %c1_i32 = arith.constant 1 : i32
    %15 = vector.broadcast %c1_i32 : i32 to vector<64x4xi32>
    %16 = arith.addi %11, %15 : vector<64x4xi32>
    %c16_i32_12 = arith.constant 16 : i32
    %17 = vector.broadcast %c16_i32_12 : i32 to vector<64x4xi32>
    %18 = arith.muli %16, %17 : vector<64x4xi32>
    %19 = arith.cmpi slt, %10, %18 : vector<64x4xi32>
    %20 = arith.andi %14, %19 : vector<64x4xi1>
    %21 = arith.extui %20 : vector<64x4xi1> to vector<64x4xi32>
    %22 = arith.sitofp %21 : vector<64x4xi32> to vector<64x4xf32>
    %23 = tpu.iota {dimensions = array<i32: 1>} : vector<4x64xi32>
    %24 = tpu.iota {dimensions = array<i32: 0>} : vector<4x64xi32>
    %c16_i32_13 = arith.constant 16 : i32
    %25 = vector.broadcast %c16_i32_13 : i32 to vector<4x64xi32>
    %26 = arith.muli %24, %25 : vector<4x64xi32>
    %27 = arith.cmpi sge, %23, %26 : vector<4x64xi32>
    %c1_i32_14 = arith.constant 1 : i32
    %28 = vector.broadcast %c1_i32_14 : i32 to vector<4x64xi32>
    %29 = arith.addi %24, %28 : vector<4x64xi32>
    %c16_i32_15 = arith.constant 16 : i32
    %30 = vector.broadcast %c16_i32_15 : i32 to vector<4x64xi32>
    %31 = arith.muli %29, %30 : vector<4x64xi32>
    %32 = arith.cmpi slt, %23, %31 : vector<4x64xi32>
    %33 = arith.andi %27, %32 : vector<4x64xi1>
    %34 = arith.extui %33 : vector<4x64xi1> to vector<4x64xi32>
    %35 = arith.sitofp %34 : vector<4x64xi32> to vector<4x64xf32>
    %36 = vector.shape_cast %3 : vector<64x64xf32> to vector<8x8x64xf32>
    %37 = vector.shape_cast %5 : vector<64x64xf32> to vector<8x8x64xf32>
    %38 = vector.shape_cast %9 : vector<8x64xf32> to vector<8x1x64xf32>
    %39 = vector.broadcast %38 : vector<8x1x64xf32> to vector<8x8x64xf32>
    %40 = arith.mulf %39, %36 : vector<8x8x64xf32>
    %41 = vector.shape_cast %40 : vector<8x8x64xf32> to vector<64x64xf32>
    %cst_16 = arith.constant dense<0.000000e+00> : vector<64x4xf32>
    %42 = tpu.matmul %41, %22, %cst_16 {dimension_numbers = #tpu.dot_dimension_numbers<[1], [0], [0], [1], [0, 0, 1, 1], [], []>} : vector<64x64xf32>, vector<64x4xf32>, vector<64x4xf32> -> vector<64x4xf32>
    %43 = vector.shape_cast %42 : vector<64x4xf32> to vector<8x8x4xf32>
    %cst_17 = arith.constant dense<0xFF800000> : vector<8x4xf32>
    %44 = vector.multi_reduction <maximumf>, %43, %cst_17 [1] : vector<8x8x4xf32> to vector<8x4xf32>
    %45 = vector.shape_cast %44 : vector<8x4xf32> to vector<8x1x4xf32>
    %46 = vector.broadcast %45 : vector<8x1x4xf32> to vector<8x8x4xf32>
    %47 = arith.subf %43, %46 : vector<8x8x4xf32>
    %48 = math.exp %47 : vector<8x8x4xf32>
    %cst_18 = arith.constant dense<0.000000e+00> : vector<8x4xf32>
    %49 = vector.multi_reduction <add>, %48, %cst_18 [1] : vector<8x8x4xf32> to vector<8x4xf32>
    %50 = vector.shape_cast %49 : vector<8x4xf32> to vector<8x1x4xf32>
    %51 = tpu.reciprocal %50 {approx = true} : vector<8x1x4xf32> -> vector<8x1x4xf32>
    %52 = vector.broadcast %51 : vector<8x1x4xf32> to vector<8x8x4xf32>
    %53 = arith.mulf %48, %52 : vector<8x8x4xf32>
    %54 = vector.shape_cast %53 : vector<8x8x4xf32> to vector<64x4xf32>
    %cst_19 = arith.constant dense<0.000000e+00> : vector<64x64xf32>
    %55 = tpu.matmul %54, %35, %cst_19 {dimension_numbers = #tpu.dot_dimension_numbers<[1], [0], [0], [1], [0, 0, 1, 1], [], []>} : vector<64x4xf32>, vector<4x64xf32>, vector<64x64xf32> -> vector<64x64xf32>
    %56 = vector.shape_cast %55 : vector<64x64xf32> to vector<8x8x64xf32>
    %57 = arith.mulf %56, %37 : vector<8x8x64xf32>
    %cst_20 = arith.constant dense<0.000000e+00> : vector<8x64xf32>
    %58 = vector.multi_reduction <add>, %57, %cst_20 [1] : vector<8x8x64xf32> to vector<8x64xf32>
    %59 = arith.truncf %58 : vector<8x64xf32> to vector<8x64xbf16>
    %c0_21 = arith.constant 0 : index
    %c0_22 = arith.constant 0 : index
    %60 = vector.load %arg6[%c0_21, %c0_22] : memref<64x32xbf16, #tpu.memory_space<vmem>>, vector<64x32xbf16>
    %cst_23 = arith.constant dense<0.000000e+00> : vector<8x32xf32>
    %61 = tpu.matmul %59, %60, %cst_23 {dimension_numbers = #tpu.dot_dimension_numbers<[1], [0], [0], [1], [0, 0, 1, 1], [], []>} : vector<8x64xbf16>, vector<64x32xbf16>, vector<8x32xf32> -> vector<8x32xf32>
    %c0_24 = arith.constant 0 : index
    %c0_25 = arith.constant 0 : index
    %62 = vector.load %arg7[%c0_24, %c0_25] : memref<1x32xf32, #tpu.memory_space<vmem>>, vector<1x32xf32>
    %63 = vector.broadcast %62 : vector<1x32xf32> to vector<8x32xf32>
    %64 = arith.addf %61, %63 : vector<8x32xf32>
    %c0_26 = arith.constant 0 : index
    %c0_27 = arith.constant 0 : index
    %65 = vector.load %arg8[%c0_26, %c0_27] : memref<8x32xf32, #tpu.memory_space<vmem>>, vector<8x32xf32>
    tpu.vector_store %arg8[%c0_26, %c0_27], %64 {strides = array<i32>} : memref<8x32xf32, #tpu.memory_space<vmem>>, vector<8x32xf32>,
    return
  }
  func.func @transform_0(%arg0: i32) -> (i32, i32) {
    %c0_i32 = arith.constant 0 : i32
    %c0_i32_0 = arith.constant 0 : i32
    return %arg0, %c0_i32 : i32, i32
  }
  func.func @transform_1(%arg0: i32) -> (i32, i32) {
    %c0_i32 = arith.constant 0 : i32
    %c0_i32_0 = arith.constant 0 : i32
    return %arg0, %c0_i32 : i32, i32
  }
  func.func @transform_2(%arg0: i32) -> (i32, i32) {
    %c0_i32 = arith.constant 0 : i32
    %c0_i32_0 = arith.constant 0 : i32
    %c0_i32_1 = arith.constant 0 : i32
    return %c0_i32, %c0_i32_0 : i32, i32
  }
  func.func @transform_3(%arg0: i32) -> (i32, i32) {
    %c0_i32 = arith.constant 0 : i32
    %c0_i32_0 = arith.constant 0 : i32
    %c0_i32_1 = arith.constant 0 : i32
    return %c0_i32, %c0_i32_0 : i32, i32
  }
  func.func @transform_4(%arg0: i32) -> (i32, i32) {
    %c0_i32 = arith.constant 0 : i32
    %c0_i32_0 = arith.constant 0 : i32
    %c0_i32_1 = arith.constant 0 : i32
    return %c0_i32, %c0_i32_0 : i32, i32
  }
  func.func @transform_5(%arg0: i32) -> (i32, i32) {
    %c0_i32 = arith.constant 0 : i32
    %c0_i32_0 = arith.constant 0 : i32
    %c0_i32_1 = arith.constant 0 : i32
    return %c0_i32, %c0_i32_0 : i32, i32
  }
  func.func @transform_6(%arg0: i32) -> (i32, i32) {
    %c0_i32 = arith.constant 0 : i32
    %c0_i32_0 = arith.constant 0 : i32
    %c0_i32_1 = arith.constant 0 : i32
    return %c0_i32, %c0_i32_0 : i32, i32
  }
  func.func @transform_7(%arg0: i32) -> (i32, i32) {
    %c0_i32 = arith.constant 0 : i32
    %c0_i32_0 = arith.constant 0 : i32
    return %arg0, %c0_i32 : i32, i32
  }
}

</mosaic_0001>

<bundles_post_ra>
// kernel: tpu_custom_call.1
= control target key start
LH: loop header
LB: loop body
LE: loop exit
PB: predicated region body
PF: predicated region fallthrough
CT: control target
= control target key end

     0   :  { %12 = vsyncpa [#allocation3], 0  ;;  %s2097_s0 = inlined_call_operand.vmem [shape: bf16[128,32], index: 0, kind: input, shape index: {}]   ;;  %s2098_s1 = inlined_call_operand.vmem [shape: bf16[16,32], index: 1, kind: input, shape index: {}]   ;;  %s2099_s2 = inlined_call_operand.vmem [shape: bf16[32,64], index: 2, kind: input, shape index: {}]   ;;  %s2100_s3 = inlined_call_operand.vmem [shape: bf16[32,64], index: 3, kind: input, shape index: {}]   ;;  %s2101_s4 = inlined_call_operand.vmem [shape: bf16[32,64], index: 4, kind: input, shape index: {}]   ;;  %s2102_s5 = inlined_call_operand.vmem [shape: bf16[64,32], index: 5, kind: input, shape index: {}]   ;;  %s2103_s6 = inlined_call_operand.vmem [shape: f32[1,32], index: 6, kind: input, shape index: {}]   ;;  %s2104_s7 = inlined_call_operand.hbm [shape: f32[16,32], index: 7, kind: output, shape index: {}]  }
   0x1   :  { %14 = vsyncpa [#allocation3 + $0x1], 0  ;;  %s1824_s24 = smov 0   ;;  %s1826_s25 = smov 0  }
   0x2   :  { %s1828_s26 = smov 0   ;;  %s1830_s27 = smov 0  }
   0x3 LB: > { %s1845_s28 = sadd.s32 4294967295, %s1777_s27   ;;  %s1408_s29 = sadd.s32 4294967294, %s1777_s27   ;;  %s1777_s27 = sphi %s1830_s27, %s2112_s27   ;;  %s1773_s26 = sphi %s1828_s26, %s2111_s26   ;;  %s1769_s25 = sphi %s1826_s25, %s2110_s25   ;;  %s1765_s24 = sphi %s1824_s24, %s2109_s24  }
   0x4   : > { %s1849_s30 = sadd.s32 1, %s1777_s27   ;;  %s184_s8 = sadd.s32 1, %s1773_s26 }
   0x5   : > { %s181_s9 = ssub.s32 %s1777_s27, %s1849_s30  ;;  %p194_p0 = scmp.ne.s32.totalorder %s1773_s26, %s1769_s25 }
   0x6   : > { %p182_p1 = scmp.eq.s32.totalorder %s181_s9, 0  ;;  %p195_p2 = scmp.eq.s32.totalorder %s1845_s28, 1 }
   0x7   : > { %p200_p3 = scmp.ne.s32.totalorder %s1769_s25, %s1765_s24  ;;  %p201_p4 = scmp.eq.s32.totalorder %s1408_s29, 1 }
   0x8   : > { %s1860_s10 = scalar_select %p182_p1, %s1773_s26, %s184_s8  }
   0x9   : > { %p1862_p5 = por %p195_p2, %p194_p0  ;;  %p1866_p6 = por %p201_p4, %p200_p3 }
   0xa   : > { %p1411_p7 = scmp.ge.s32.totalorder %s1777_s27, 1  ;;  %p250_p8 = scmp.lt.s32.totalorder %s1777_s27, 3 }
   0xc   : > { %p251_p9 = pnand %p1411_p7, %p250_p8 }
   0xd   : > { %v1669_v0 = vld [vmem:[%s2100_s3] sm:$0xff] (!%p251_p9)   ;;  %s1413_s15 = sshll.u32 (!%p251_p9), %s1845_s28, 3  ;;  %v1670_v1 = vld [vmem:[%s2100_s3 + $0x8] sm:$0xff] (!%p251_p9)   ;;  %vm2105_vm0 = vcmask (!%p251_p9), 261120   ;;  %v1779_v5 = vmov (!%p251_p9), 0.0   ;;  %p292_p11 = scmp.lt.s32.totalorder (!%p251_p9), %s1845_s28, 1  ;;  %v561_v11 = vlaneseq (!%p251_p9) }
   0xe   : > { %254 = sbr.rel (%p251_p9) target bundleno = 1013 (0x3f5), region = 48  ;;  %p287_p10 = scmp.lt.s32.totalorder (!%p251_p9), %s1413_s15, 15  ;;  %1524 = vmatprep.subr.bf16.mxu0 (!%p251_p9), %v1669_v0  ;;  %v1673_v2 = vld [vmem:[%s2099_s2] sm:$0xff] (!%p251_p9)   ;;  %v1676_v7 = vld [vmem:[%s2099_s2 + $0x8] sm:$0xff] (!%p251_p9)   ;;  %vm1780_vm1 = vmmov (!%p251_p9), 0  }
   0xf   : > { %1525 = vmatpush3.bf16.msra.mxu0 (!%p251_p9), %v1669_v0  ;;  %v1677_v10 = vld [vmem:[%s2101_s4] sm:$0xff] (!%p251_p9)   ;;  %v1678_v12 = vld [vmem:[%s2101_s4 + $0x8] sm:$0xff] (!%p251_p9)   ;;  %v1909_v13 = vand.u32 (!%p251_p9), 127, %v561_v11  ;;  %v1911_v14 = vshrl.u32 (!%p251_p9), %v561_v11, 7  ;;  %v1781_v21 = vmov (!%p251_p9), 1.0|1.0  }
  0x10   : > { %1526 = vmatprep.subr.bf16.mxu0 (!%p251_p9), %v1670_v1  ;;  %1536 = vmatprep.subr.bf16.mxu1 (!%p251_p9), %v1677_v10  ;;  %v1782_v30 = vmov (!%p251_p9), 1966171168   ;;  %s1476_s19 = sshll.u32 (!%p251_p9), %s1845_s28, 7 }
  0x11   : > { %1537 = vmatpush3.bf16.msra.mxu1 (!%p251_p9), %v1677_v10  ;;  %v581_v15 = vadd.s32 (!%p251_p9), 1, %v1909_v13  ;;  %v563_v16 = vadd.s32 (!%p251_p9), 8, %v1911_v14  ;;  %v572_v17 = vmul.u32 (!%p251_p9), 16, %v1909_v13  ;;  %v564_v19 = vadd.s32 (!%p251_p9), 16, %v1911_v14  ;;  %s2054_s29 = scalar_lea.hbm (!%p251_p9), %s2104_s7, %s1476_s19 }
  0x12   : > { %1538 = vmatprep.subr.bf16.mxu1 (!%p251_p9), %v1678_v12  ;;  %v565_v20 = vadd.s32 (!%p251_p9), 24, %v1911_v14  ;;  %v566_v22 = vadd.s32 (!%p251_p9), 32, %v1911_v14  ;;  %v567_v23 = vadd.s32 (!%p251_p9), 40, %v1911_v14  ;;  %v568_v24 = vadd.s32 (!%p251_p9), 48, %v1911_v14 }
  0x13   : > { %1527 = vmatpush3.bf16.msra.mxu0 (!%p251_p9), %v1670_v1  ;;  %v582_v18 = vmul.u32 (!%p251_p9), 16, %v581_v15  ;;  %vm573_vm2 = vcmp.ge.s32.totalorder (!%p251_p9), %v1911_v14, %v572_v17  ;;  %vm574_vm3 = vcmp.ge.s32.totalorder (!%p251_p9), %v563_v16, %v572_v17  ;;  %vm575_vm9 = vcmp.ge.s32.totalorder (!%p251_p9), %v564_v19, %v572_v17 }
  0x14   : > { %1548 = vmatprep.subr.bf16.mxu0 (!%p251_p9), %v1779_v5  ;;  %vm576_vm10 = vcmp.ge.s32.totalorder (!%p251_p9), %v565_v20, %v572_v17  ;;  %v569_v25 = vadd.s32 (!%p251_p9), 56, %v1911_v14  ;;  %v626_v31 = vunpack.c.l.s4 (!%p251_p9), %v1782_v30  ;;  %v675_v45 = vsub.s32 (!%p251_p9), 0, %v1911_v14 }
  0x15   : > { %s2114_s15 = smov (!%p287_p10, %s1413_s15), 15  ;;  %1539 = vmatpush3.bf16.msra.mxu1 %v1678_v12  ;;  %vm583_vm4 = vcmp.lt.s32.totalorder %v1911_v14, %v582_v18  ;;  %vm584_vm5 = vcmp.lt.s32.totalorder %v563_v16, %v582_v18  ;;  %vm585_vm11 = vcmp.lt.s32.totalorder %v564_v19, %v582_v18  ;;  %vm586_vm12 = vcmp.lt.s32.totalorder %v565_v20, %v582_v18 }
  0x16   : > { %s1414_s18 = sshll.u32 %s2114_s15, 2  ;;  %vm591_vm6 = vmand %vm573_vm2, %vm583_vm4  ;;  %vm577_vm2 = vcmp.ge.s32.totalorder %v566_v22, %v572_v17  ;;  %vm587_vm4 = vcmp.lt.s32.totalorder %v566_v22, %v582_v18  ;;  %v627_v36 = vunpack.c.0.s8 %v626_v31  ;;  %v617_v20 = vadd.s32 1, %v1911_v14  ;;  %s283_s15 = sand.u32 1, %s1769_s25  }
  0x17   : > { %s290_s23 = scalar_lea.vmem %s2097_s0, %s1414_s18  ;;  %vm592_vm7 = vmand %vm574_vm3, %vm584_vm5  ;;  %vm578_vm3 = vcmp.ge.s32.totalorder %v567_v23, %v572_v17  ;;  %vm588_vm5 = vcmp.lt.s32.totalorder %v567_v23, %v582_v18 }
  0x18   : > { %v1671_v3 = vld [vmem:[%s290_s23] sm:$0xff]   ;;  %v1672_v4 = vld [vmem:[%s290_s23 + $0x8] sm:$0xff]   ;;  %v1674_v6 = vld [vmem:[%s290_s23 + $0x10] sm:$0xff]   ;;  %s293_s9 = scalar_select %p292_p11, %s1845_s28, 1  ;;  %v630_v37 = vsub.s32 %v627_v36, %v1911_v14  ;;  %v618_v22 = vmul.u32 16, %v617_v20 }
  0x19   : > { %1528 = vmatprep.mubr.msk.bf16.mxu0 %vm2105_vm0, %v1671_v3  ;;  %1540 = vmatprep.mubr.msk.bf16.mxu1 %vm2105_vm0, %v1671_v3  ;;  %v1675_v8 = vld [vmem:[%s290_s23 + $0x18] sm:$0xff]   ;;  %vm1610_vm8 = vmpackc.low %vm592_vm7, %vm591_vm6  ;;  %s1324_s28 = scalar_lea.sflag [#allocation3], %s283_s15 }
  0x1a   : > { %1529 = vmatmul.mubr.msk.bf16.vlgmr.msra.gmra.mrb[0].mxu0 %vm2105_vm0, %v1672_v4  ;;  %s1415_s13 = sshll.u32 %s293_s9, 2  ;;  %1541 = vmatmul.mubr.msk.bf16.vlgmr.msra.gmra.mrb[0].mxu1 %vm2105_vm0, %v1672_v4  ;;  %vm593_vm13 = vmand %vm575_vm9, %vm585_vm11  ;;  %vm579_vm9 = vcmp.ge.s32.totalorder %v568_v24, %v572_v17  ;;  %vm589_vm11 = vcmp.lt.s32.totalorder %v568_v24, %v582_v18  ;;  %s1783_s9 = smov [#allocation2]  }
  0x1b   : > { %1549 = vmatpush3.bf16.msra.mxu0 %v1673_v2  ;;  %1532 = vmatprep.mubr.msk.bf16.mxu0 %vm2105_vm0, %v1674_v6  ;;  %s295_s16 = scalar_lea.vmem %s2098_s1, %s1415_s13  ;;  %vm594_vm14 = vmand %vm576_vm10, %vm586_vm12  ;;  %vm580_vm10 = vcmp.ge.s32.totalorder %v569_v25, %v572_v17  ;;  %vm590_vm12 = vcmp.lt.s32.totalorder %v569_v25, %v582_v18  ;;  %s1719_s13 = sshll.u32 %s1783_s9, 4  ;;  %s1720_s13 = int_to_ptr.vmem [resolvable:$false] %s1719_s13 }
  0x1c   : > { %1550 = vmatprep.subr.bf16.mxu0 %v1779_v5  ;;  %v305_v9 = vld [vmem:[%s295_s16] sm:$0xf]  ;;  %1544 = vmatprep.mubr.msk.bf16.mxu1 %vm2105_vm0, %v1674_v6  ;;  %vm1614_vm15 = vmpackc.low %vm594_vm14, %vm593_vm13  ;;  %s1412_s16 = sshll.u32 %s283_s15, 3  ;;  %s1721_s14 = scalar_lea.vmem %s1720_s13, 256 }
  0x1d   : > { %1611 = vmatprep.subr.msk.bf16.mxu1 %vm1610_vm8, %v1781_v21  ;;  %vm595_vm6 = vmand %vm577_vm2, %vm587_vm4  ;;  %vm851_vm4 = vcmask 31744   ;;  %s285_s20 = scalar_lea.vmem [#allocation2], %s1412_s16 }
  0x1e   : > { %1613 = vmatpush3.bf16.msk.msra.mxu1 %vm1610_vm8, %v1781_v21  ;;  %vm596_vm7 = vmand %vm578_vm3, %vm588_vm5  ;;  %vm1028_vm3 = vcmask 1043456   ;;  %vm1240_vm5 = vcmask 1041409   ;;  %s1337_s21 = sshll.u32 %s285_s20, 4  ;;  %s2056_s21 = int_to_ptr.vmem [resolvable:$true] %s1337_s21 }
  0x1f   : > { %1551 = vmatpush3.bf16.msra.mxu0 %v1676_v7  ;;  %1615 = vmatprep.subr.msk.bf16.mxu1 %vm1614_vm15, %v1781_v21  ;;  %vm1618_vm8 = vmpackc.low %vm596_vm7, %vm595_vm6  ;;  %vm1242_vm6 = vcmask 1042434   ;;  %vm1244_vm7 = vcmask 1043459   ;;  %s1715_s8 = scalar_lea.vmem %s2056_s21, 128  ;;  %p1722_p1 = scmp.lt.s32.totalorder %s2056_s21, %s1720_s13 }
  0x20   : > { %vm597_vm13 = vmand %vm579_vm9, %vm589_vm11  ;;  %vm1248_vm9 = vcmask 1045509   ;;  %vm1252_vm11 = vcmask 1047559   ;;  %p1716_p12 = scmp.ne.s32.totalorder %s2056_s21, %s1715_s8  ;;  %p1723_p2 = scmp.lt.s32.totalorder %s1721_s14, %s1715_s8 }
  0x21   : > { %vm598_vm14 = vmand %vm580_vm10, %vm590_vm12  ;;  %vm1250_vm10 = vcmask 1046534   ;;  %vm2108_vm12 = vcmask 261120  }
  0x22   : > { %1533 = vmatmul.mubr.msk.bf16.gmra.mrb[4].mxu0 %vm2105_vm0, %v1675_v8  ;;  %1545 = vmatmul.mubr.msk.bf16.gmra.mrb[4].mxu1 %vm2105_vm0, %v1675_v8  ;;  %p1717_p13 = pnand %p1716_p12, %p1862_p5  ;;  %p1724_p3 = por %p1723_p2, %p1722_p1 }
  0x23   : > { %1552 = vmatprep.mubr.msk.bf16.mxu0 %vm1780_vm1, %v1779_v5  ;;  %1617 = vmatpush3.bf16.msk.msra.mxu1 %vm1614_vm15, %v1781_v21  ;;  %vm619_vm15 = vcmp.lt.s32.totalorder %v1909_v13, %v618_v22 }
  0x24   : > { %1619 = vmatprep.subr.msk.bf16.mxu1 %vm1618_vm8, %v1781_v21  ;;  %p1718_p0 = pneg %p1717_p13 }
  0x26   : > { %p1725_p4 = pnand %p1724_p3, %p1718_p0 }
  0x27   : > { %1621 = vmatpush3.bf16.msk.msra.mxu1 %vm1618_vm8, %v1781_v21  ;;  %vm1246_vm8 = vcmask 1044484  }
  0x2a   : > { %1553 = vmatmul.mubr.msk.bf16.vlgmr.msra.gmra.mrb[8].mxu0 %vm2105_vm0, %v305_v9  ;;  %vm1622_vm0 = vmpackc.low %vm598_vm14, %vm597_vm13 }
  0x2b   : > { %1623 = vmatprep.subr.msk.bf16.mxu1 %vm1622_vm0, %v1781_v21 }
  0x2c   : > { %1625 = vmatpush3.bf16.msk.msra.mxu1 %vm1622_vm0, %v1781_v21  ;;  %vm721_vm0 = vcmask 523264   ;;  %v615_v21 = vmul.u32 16, %v1911_v14 }
  0x2d   : > { %1598 = vmatprep.subr.bf16.mxu1 %v1779_v5 }
  0xed   : > { %v1530_v26 = vpop.f32.mrb[0].mxu0  ;;  %v1940_v10 = vpop.f32.mrb[0].mxu1 }
  0xee   : > { %v389_v27 = vpop.f32.mrb[1].mxu0  ;;  %v1942_v11 = vpop.f32.mrb[1].mxu1 }
  0xef   : > { %v1531_v28 = vpop.f32.mrb[2].mxu0  ;;  %v1944_v12 = vpop.f32.mrb[2].mxu1 }
  0xf0   : > { %v392_v29 = vpop.f32.mrb[3].mxu0  ;;  %v1946_v15 = vpop.f32.mrb[3].mxu1 }
  0xf5   : > { %v1534_v32 = vpop.f32.mrb[4].mxu0  ;;  %v1948_v16 = vpop.f32.mrb[4].mxu1 }
  0xf6   : > { %v405_v33 = vpop.f32.mrb[5].mxu0  ;;  %v1950_v17 = vpop.f32.mrb[5].mxu1 }
  0xf7   : > { %v1535_v34 = vpop.f32.mrb[6].mxu0  ;;  %v1952_v18 = vpop.f32.mrb[6].mxu1 }
  0xf8   : > { %v408_v35 = vpop.f32.mrb[7].mxu0  ;;  %v1954_v19 = vpop.f32.mrb[7].mxu1 }
  0xfd   : > { %v554_v38 = vpop.f32.mrb[8].mxu0 }
  0xfe   : > { %v560_v39 = vmul.f32 0.25, %v554_v38  ;;  %v1554_v40 = vpop.f32.mrb[9].mxu0 }
  0xff   : > { %v557_v41 = vpop.f32.mrb[10].mxu0 }
 0x100   : > { %v624_v42 = vcombine.high %v560_v39, %v560_v39  ;;  %v631_v43 = vrot.slane %v560_v39, %v630_v37  ;;  %v1555_v44 = vpop.f32.mrb[11].mxu0 }
 0x102   : > { %v638_v46 = vrot.slane %v624_v42, %v630_v37  ;;  %v639_v47 = vcombine.high %v631_v43, %v631_v43  ;;  %v647_v48 = vrot.slane %v631_v43, %v630_v37 }
 0x104   : > { %v640_v49 = vcombine.high %v638_v46, %v638_v46  ;;  %v654_v50 = vrot.slane %v638_v46, %v630_v37  ;;  %v661_v51 = vrot.slane %v639_v47, %v630_v37  ;;  %v669_v52 = vcombine.high %v647_v48, %v647_v48 }
 0x105   : > { %v676_v53 = vrot.slane %v647_v48, %v675_v45 }
 0x106   : > { %v668_v54 = vrot.slane %v640_v49, %v630_v37  ;;  %v670_v55 = vcombine.high %v654_v50, %v654_v50  ;;  %v671_v56 = vcombine.high %v661_v51, %v661_v51  ;;  %v680_v57 = vrot.slane %v661_v51, %v675_v45 }
 0x107   : > { %v684_v58 = vrot.slane %v669_v52, %v675_v45  ;;  %v692_v59 = vrot.slane %v654_v50, %v675_v45  ;;  %v713_v60 = vmul.f32 %v676_v53, %v389_v27 }
 0x108   : > { %v672_v61 = vcombine.high %v668_v54, %v668_v54  ;;  %v714_v62 = vmul.f32 %v680_v57, %v392_v29  ;;  %v688_v63 = vrot.slane %v671_v56, %v675_v45  ;;  %v696_v0 = vrot.slane %v668_v54, %v675_v45 }
 0x109   : > { %1572 = vmatprep.mubr.msk.f32.mxu1 %vm721_vm0, %v713_v60  ;;  %v715_v1 = vmul.f32 %v1530_v26, %v684_v58  ;;  %v717_v2 = vmul.f32 %v692_v59, %v405_v33  ;;  %v700_v3 = vrot.slane %v670_v55, %v675_v45 }
 0x10a   : > { %1573 = vmatmul.mubr.msk.f32.vlgmr.msra.gmra.mrb[8].mxu1 %vm721_vm0, %v714_v62  ;;  %v716_v4 = vmul.f32 %v1531_v28, %v688_v63  ;;  %v718_v6 = vmul.f32 %v696_v0, %v408_v35  ;;  %v704_v7 = vrot.slane %v672_v61, %v675_v45 }
 0x10b   : > { %1575 = vmatprep.mubr.msk.f32.mxu1 %vm721_vm0, %v715_v1  ;;  %v719_v8 = vmul.f32 %v1534_v32, %v700_v3 }
 0x10c   : > { %v720_v9 = vmul.f32 %v1535_v34, %v704_v7 }
 0x10e   : > { %1576 = vmatmul.mubr.msk.f32.gmra.mrb[10].mxu1 %vm721_vm0, %v716_v4 }
 0x10f   : > { %1578 = vmatprep.mubr.msk.f32.mxu1 %vm721_vm0, %v717_v2 }
 0x112   : > { %1579 = vmatmul.mubr.msk.f32.gmra.mrb[12].mxu1 %vm721_vm0, %v718_v6 }
 0x113   : > { %1581 = vmatprep.mubr.msk.f32.mxu1 %vm721_vm0, %v719_v8 }
 0x116   : > { %1582 = vmatmul.mubr.msk.f32.gmra.mrb[14].mxu1 %vm721_vm0, %v720_v9 }
 0x117   : > { %1606 = vmatprep.mubr.msk.bf16.mxu1 %vm1780_vm1, %v1779_v5  ;;  %vm616_vm1 = vcmp.ge.s32.totalorder %v1909_v13, %v615_v21 }
 0x118   : > { %vm620_vm2 = vmand %vm616_vm1, %vm619_vm15 }
 0x119   : > { %v1443_v23 = vsel %vm620_vm2, 1.0, %v1779_v5 }
 0x11a   : > { %1584 = vmatprep.subr.msk.mxu0 %vm1028_vm3, %v1443_v23 }
 0x11b   : > { %1585 = vmatpush3.msk.msra.mxu0 %vm1028_vm3, %v1443_v23 }
 0x1dd   : > { %v1574_v24 = vpop.f32.mrb[8].mxu1 }
 0x1de   : > { %v859_v25 = vsel %vm851_vm4, %v1574_v24, -inf  ;;  %v812_v26 = vpop.f32.mrb[9].mxu1 }
 0x1df   : > { %v860_v27 = vrot.slane %v859_v25, 4  ;;  %v852_v28 = vsel %vm851_vm4, %v812_v26, -inf }
 0x1e0   : > { %v853_v14 = vrot.slane %v852_v28, 4 }
 0x1e1   : > { %v861_v29 = vmax.f32 %v859_v25, %v860_v27  ;;  %v1577_v30 = vpop.f32.mrb[10].mxu1 }
 0x1e2   : > { %v854_v31 = vmax.f32 %v852_v28, %v853_v14  ;;  %v873_v13 = vsel %vm851_vm4, %v1577_v30, -inf  ;;  %v822_v32 = vpop.f32.mrb[11].mxu1 }
 0x1e3   : > { %v862_v33 = vrot.slane %v861_v29, 2  ;;  %v874_v34 = vrot.slane %v873_v13, 4  ;;  %v866_v35 = vsel %vm851_vm4, %v822_v32, -inf }
 0x1e4   : > { %v855_v36 = vrot.slane %v854_v31, 2  ;;  %v867_v37 = vrot.slane %v866_v35, 4 }
 0x1e5   : > { %v863_v38 = vmax.f32 %v861_v29, %v862_v33  ;;  %v875_v39 = vmax.f32 %v873_v13, %v874_v34  ;;  %v1580_v40 = vpop.f32.mrb[12].mxu1 }
 0x1e6   : > { %v856_v41 = vmax.f32 %v854_v31, %v855_v36  ;;  %v868_v42 = vmax.f32 %v866_v35, %v867_v37  ;;  %v887_v43 = vsel %vm851_vm4, %v1580_v40, -inf  ;;  %v832_v44 = vpop.f32.mrb[13].mxu1 }
 0x1e7   : > { %v864_v45 = vrot.slane %v863_v38, 1  ;;  %v876_v46 = vrot.slane %v875_v39, 2  ;;  %v888_v47 = vrot.slane %v887_v43, 4  ;;  %v880_v48 = vsel %vm851_vm4, %v832_v44, -inf }
 0x1e8   : > { %v857_v49 = vrot.slane %v856_v41, 1  ;;  %v869_v50 = vrot.slane %v868_v42, 2  ;;  %v881_v51 = vrot.slane %v880_v48, 4 }
 0x1e9   : > { %v865_v52 = vmax.f32 %v863_v38, %v864_v45  ;;  %v877_v53 = vmax.f32 %v875_v39, %v876_v46  ;;  %v889_v54 = vmax.f32 %v887_v43, %v888_v47  ;;  %v1583_v55 = vpop.f32.mrb[14].mxu1 }
 0x1ea   : > { %v858_v56 = vmax.f32 %v856_v41, %v857_v49  ;;  %v870_v57 = vmax.f32 %v868_v42, %v869_v50  ;;  %v882_v58 = vmax.f32 %v880_v48, %v881_v51  ;;  %v901_v59 = vsel %vm851_vm4, %v1583_v55, -inf  ;;  %v842_v60 = vpop.f32.mrb[15].mxu1 }
 0x1eb   : > { %v909_v61 = vsub.f32 %v1574_v24, %v865_v52  ;;  %v878_v62 = vrot.slane %v877_v53, 1  ;;  %v890_v63 = vrot.slane %v889_v54, 2  ;;  %v902_v0 = vrot.slane %v901_v59, 4 }
 0x1ec   : > { %v908_v1 = vsub.f32 %v812_v26, %v858_v56  ;;  %v871_v2 = vrot.slane %v870_v57, 1  ;;  %v883_v3 = vrot.slane %v882_v58, 2  ;;  %v894_v4 = vsel %vm851_vm4, %v842_v60, -inf }
 0x1ed   : > { %v918_v6 = vmul.f32 1.442695, %v909_v61  ;;  %v879_v7 = vmax.f32 %v877_v53, %v878_v62  ;;  %v891_v8 = vmax.f32 %v889_v54, %v890_v63  ;;  %v903_v9 = vmax.f32 %v901_v59, %v902_v0 }
 0x1ee   : > { %v916_v20 = vmul.f32 1.442695, %v908_v1  ;;  %v872_v21 = vmax.f32 %v870_v57, %v871_v2  ;;  %v884_v22 = vmax.f32 %v882_v58, %v883_v3  ;;  %v895_v23 = vrot.slane %v894_v4, 4 }
 0x1ef   : > { %1683 = vpow2.f32 %v918_v6  ;;  %v911_v25 = vsub.f32 %v1577_v30, %v879_v7  ;;  %v892_v27 = vrot.slane %v891_v8, 1  ;;  %v904_v24 = vrot.slane %v903_v9, 2 }
 0x1f0   : > { %1685 = vpow2.f32 %v916_v20  ;;  %v910_v28 = vsub.f32 %v822_v32, %v872_v21  ;;  %v885_v14 = vrot.slane %v884_v22, 1  ;;  %v896_v26 = vmax.f32 %v894_v4, %v895_v23 }
 0x1f1   : > { %v922_v29 = vmul.f32 1.442695, %v911_v25  ;;  %v893_v31 = vmax.f32 %v891_v8, %v892_v27  ;;  %v905_v13 = vmax.f32 %v903_v9, %v904_v24 }
 0x1f2   : > { %v920_v33 = vmul.f32 1.442695, %v910_v28  ;;  %v886_v34 = vmax.f32 %v884_v22, %v885_v14  ;;  %v897_v35 = vrot.slane %v896_v26, 2 }
 0x1f3   : > { %1687 = vpow2.f32 %v922_v29  ;;  %v913_v36 = vsub.f32 %v1580_v40, %v893_v31  ;;  %v906_v37 = vrot.slane %v905_v13, 1 }
 0x1f4   : > { %1689 = vpow2.f32 %v920_v33  ;;  %v912_v38 = vsub.f32 %v832_v44, %v886_v34  ;;  %v898_v39 = vmax.f32 %v896_v26, %v897_v35 }
 0x1f5   : > { %v926_v41 = vmul.f32 1.442695, %v913_v36  ;;  %v907_v30 = vmax.f32 %v905_v13, %v906_v37 }
 0x1f6   : > { %v924_v42 = vmul.f32 1.442695, %v912_v38  ;;  %v899_v43 = vrot.slane %v898_v39, 1 }
 0x1f7   : > { %1691 = vpow2.f32 %v926_v41  ;;  %v915_v32 = vsub.f32 %v1583_v55, %v907_v30 }
 0x1f8   : > { %1693 = vpow2.f32 %v924_v42  ;;  %v900_v45 = vmax.f32 %v898_v39, %v899_v43 }
 0x1f9   : > { %v1969_v46 = vpop.eup %1683  ;;  %v930_v47 = vmul.f32 1.442695, %v915_v32 }
 0x1fa   : > { %v1971_v48 = vpop.eup %1685  ;;  %v939_v40 = vsel %vm851_vm4, %v1969_v46, 0.0  ;;  %v914_v49 = vsub.f32 %v842_v60, %v900_v45 }
 0x1fb   : > { %v940_v50 = vrot.slane %v939_v40, 4  ;;  %v932_v44 = vsel %vm851_vm4, %v1971_v48, 0.0  ;;  %1695 = vpow2.f32 %v930_v47 }
 0x1fc   : > { %v933_v51 = vrot.slane %v932_v44, 4  ;;  %v928_v52 = vmul.f32 1.442695, %v914_v49 }
 0x1fd   : > { %v1977_v53 = vpop.eup %1687  ;;  %v941_v54 = vadd.f32 %v940_v50, %v939_v40 }
 0x1fe   : > { %v1979_v55 = vpop.eup %1689  ;;  %v934_v56 = vadd.f32 %v933_v51, %v932_v44  ;;  %v953_v57 = vsel %vm851_vm4, %v1977_v53, 0.0  ;;  %1697 = vpow2.f32 %v928_v52 }
 0x1ff   : > { %v942_v58 = vrot.slane %v941_v54, 2  ;;  %v954_v59 = vrot.slane %v953_v57, 4  ;;  %v946_v60 = vsel %vm851_vm4, %v1979_v55, 0.0 }
 0x200   : > { %v935_v61 = vrot.slane %v934_v56, 2  ;;  %v947_v62 = vrot.slane %v946_v60, 4 }
 0x201   : > { %v1985_v63 = vpop.eup %1691  ;;  %v943_v0 = vadd.f32 %v942_v58, %v941_v54  ;;  %v955_v1 = vadd.f32 %v954_v59, %v953_v57 }
 0x202   : > { %v1987_v2 = vpop.eup %1693  ;;  %v936_v3 = vadd.f32 %v935_v61, %v934_v56  ;;  %v948_v4 = vadd.f32 %v947_v62, %v946_v60  ;;  %v967_v6 = vsel %vm851_vm4, %v1985_v63, 0.0 }
 0x203   : > { %v944_v7 = vrot.slane %v943_v0, 1  ;;  %v956_v8 = vrot.slane %v955_v1, 2  ;;  %v968_v9 = vrot.slane %v967_v6, 4  ;;  %v960_v20 = vsel %vm851_vm4, %v1987_v2, 0.0 }
 0x204   : > { %v937_v21 = vrot.slane %v936_v3, 1  ;;  %v949_v22 = vrot.slane %v948_v4, 2  ;;  %v961_v23 = vrot.slane %v960_v20, 4 }
 0x205   : > { %v1993_v25 = vpop.eup %1695  ;;  %v945_v27 = vadd.f32 %v944_v7, %v943_v0  ;;  %v957_v24 = vadd.f32 %v956_v8, %v955_v1  ;;  %v969_v28 = vadd.f32 %v968_v9, %v967_v6 }
 0x206   : > { %v938_v14 = vadd.f32 %v937_v21, %v936_v3  ;;  %v950_v26 = vadd.f32 %v949_v22, %v948_v4  ;;  %v962_v29 = vadd.f32 %v961_v23, %v960_v20  ;;  %v981_v31 = vsel %vm851_vm4, %v1993_v25, 0.0  ;;  %v1682_v22 = vld [vmem:[%s2102_s5 + $0x18] sm:$0xff]  }
 0x207   : > { %1699 = vrcp.f32 %v945_v27  ;;  %v958_v13 = vrot.slane %v957_v24, 1  ;;  %v970_v33 = vrot.slane %v969_v28, 2  ;;  %v982_v34 = vrot.slane %v981_v31, 4 }
 0x208   : > { %v1698_v35 = vpop.eup %1697  ;;  %v951_v36 = vrot.slane %v950_v26, 1  ;;  %v963_v37 = vrot.slane %v962_v29, 2  ;;  %1701 = vrcp.f32 %v938_v14 }
 0x209   : > { %v959_v38 = vadd.f32 %v958_v13, %v957_v24  ;;  %v971_v39 = vadd.f32 %v970_v33, %v969_v28  ;;  %v983_v41 = vadd.f32 %v982_v34, %v981_v31  ;;  %v974_v30 = vsel %vm851_vm4, %v1698_v35, 0.0 }
 0x20a   : > { %v952_v42 = vadd.f32 %v951_v36, %v950_v26  ;;  %v964_v43 = vadd.f32 %v963_v37, %v962_v29  ;;  %v975_v32 = vrot.slane %v974_v30, 4 }
 0x20b   : > { %v972_v45 = vrot.slane %v971_v39, 1  ;;  %v984_v47 = vrot.slane %v983_v41, 2  ;;  %1703 = vrcp.f32 %v959_v38 }
 0x20c   : > { %v965_v40 = vrot.slane %v964_v43, 1  ;;  %v976_v49 = vadd.f32 %v975_v32, %v974_v30  ;;  %1705 = vrcp.f32 %v952_v42 }
 0x20d   : > { %v973_v50 = vadd.f32 %v972_v45, %v971_v39  ;;  %v985_v44 = vadd.f32 %v984_v47, %v983_v41 }
 0x20e   : > { %v966_v51 = vadd.f32 %v965_v40, %v964_v43  ;;  %v977_v52 = vrot.slane %v976_v49, 2 }
 0x20f   : > { %v986_v54 = vrot.slane %v985_v44, 1  ;;  %1707 = vrcp.f32 %v973_v50 }
 0x210   : > { %v978_v56 = vadd.f32 %v977_v52, %v976_v49  ;;  %1709 = vrcp.f32 %v966_v51 }
 0x211   : > { %v1700_v57 = vpop.eup %1699  ;;  %v987_v58 = vadd.f32 %v986_v54, %v985_v44 }
 0x212   : > { %v1702_v59 = vpop.eup %1701  ;;  %v979_v60 = vrot.slane %v978_v56, 1  ;;  %v997_v0 = vmul.f32 %v1700_v57, %v1969_v46 }
 0x213   : > { %v996_v61 = vmul.f32 %v1702_v59, %v1971_v48  ;;  %1711 = vrcp.f32 %v987_v58 }
 0x214   : > { %v980_v62 = vadd.f32 %v979_v60, %v978_v56 }
 0x215   : > { %v1704_v1 = vpop.eup %1703  ;;  %1586 = vmatprep.mubr.msk.f32.mxu0 %vm851_vm4, %v996_v61 }
 0x216   : > { %v1706_v3 = vpop.eup %1705  ;;  %1587 = vmatmul.mubr.msk.f32.vlgmr.msra.gmra.mrb[12].mxu0 %vm851_vm4, %v997_v0  ;;  %1713 = vrcp.f32 %v980_v62  ;;  %v999_v6 = vmul.f32 %v1704_v1, %v1977_v53  ;;  %v1679_v53 = vld [vmem:[%s2102_s5] sm:$0xff]  }
 0x217   : > { %v998_v4 = vmul.f32 %v1706_v3, %v1979_v55  ;;  %1599 = vmatpush3.bf16.msra.mxu1 %v1679_v53 }
 0x218   : > { %1600 = vmatprep.subr.bf16.mxu1 %v1779_v5 }
 0x219   : > { %v1708_v7 = vpop.eup %1707  ;;  %1589 = vmatprep.mubr.msk.f32.mxu0 %vm851_vm4, %v998_v4 }
 0x21a   : > { %v1710_v8 = vpop.eup %1709  ;;  %1590 = vmatmul.mubr.msk.f32.gmra.mrb[14].mxu0 %vm851_vm4, %v999_v6  ;;  %v1001_v48 = vmul.f32 %v1708_v7, %v1985_v63  ;;  %v1680_v63 = vld [vmem:[%s2102_s5 + $0x8] sm:$0xff]  }
 0x21b   : > { %v1000_v46 = vmul.f32 %v1710_v8, %v1987_v2  ;;  %1601 = vmatpush3.bf16.msra.mxu1 %v1680_v63  ;;  %v1681_v2 = vld [vmem:[%s2102_s5 + $0x10] sm:$0xff]  }
 0x21c   : > { %1602 = vmatprep.subr.bf16.mxu1 %v1779_v5 }
 0x21d   : > { %1592 = vmatprep.mubr.msk.f32.mxu0 %vm851_vm4, %v1000_v46  ;;  %v1712_v9 = vpop.eup %1711 }
 0x21e   : > { %1593 = vmatmul.mubr.msk.f32.gmra.mrb[16].mxu0 %vm851_vm4, %v1001_v48  ;;  %v1003_v55 = vmul.f32 %v1712_v9, %v1993_v25 }
 0x21f   : > { %1603 = vmatpush3.bf16.msra.mxu1 %v1681_v2 }
 0x220   : > { %v1714_v20 = vpop.eup %1713  ;;  %1604 = vmatprep.subr.bf16.mxu1 %v1779_v5 }
 0x221   : > { %v1002_v21 = vmul.f32 %v1714_v20, %v1698_v35 }
 0x223   : > { %1595 = vmatprep.mubr.msk.f32.mxu0 %vm851_vm4, %v1002_v21  ;;  %1605 = vmatpush3.bf16.msra.mxu1 %v1682_v22 }
 0x224   : > { %1596 = vmatmul.mubr.msk.f32.gmra.mrb[18].mxu0 %vm851_vm4, %v1003_v55 }
 0x2e9   : > { %v1588_v23 = vpop.f32.mrb[12].mxu0 }
 0x2ea   : > { %v1138_v25 = vmul.f32 %v1588_v23, %v1946_v15  ;;  %v1098_v27 = vpop.f32.mrb[13].mxu0 }
 0x2eb   : > { %v1137_v24 = vmul.f32 %v1098_v27, %v1942_v11 }
 0x2ec   : > { %v1152_v28 = vsel %vm721_vm0, %v1138_v25, 0.0 }
 0x2ed   : > { %v1153_v14 = vrot.slane %v1152_v28, 4  ;;  %v1145_v26 = vsel %vm721_vm0, %v1137_v24, 0.0  ;;  %v1591_v29 = vpop.f32.mrb[14].mxu0 }
 0x2ee   : > { %v1146_v31 = vrot.slane %v1145_v26, 4  ;;  %v1140_v5 = vmul.f32 %v1591_v29, %v1944_v12  ;;  %v1108_v13 = vpop.f32.mrb[15].mxu0 }
 0x2ef   : > { %v1154_v33 = vadd.f32 %v1153_v14, %v1152_v28  ;;  %v1139_v34 = vmul.f32 %v1940_v10, %v1108_v13 }
 0x2f0   : > { %v1147_v35 = vadd.f32 %v1146_v31, %v1145_v26  ;;  %v1166_v36 = vsel %vm721_vm0, %v1140_v5, 0.0 }
 0x2f1   : > { %v1155_v15 = vrot.slane %v1154_v33, 2  ;;  %v1167_v37 = vrot.slane %v1166_v36, 4  ;;  %v1159_v11 = vsel %vm721_vm0, %v1139_v34, 0.0  ;;  %v1594_v38 = vpop.f32.mrb[16].mxu0 }
 0x2f2   : > { %v1148_v39 = vrot.slane %v1147_v35, 2  ;;  %v1160_v41 = vrot.slane %v1159_v11, 4  ;;  %v1142_v30 = vmul.f32 %v1594_v38, %v1954_v19  ;;  %v1118_v42 = vpop.f32.mrb[17].mxu0 }
 0x2f3   : > { %v1156_v43 = vadd.f32 %v1155_v15, %v1154_v33  ;;  %v1168_v32 = vadd.f32 %v1167_v37, %v1166_v36  ;;  %v1141_v12 = vmul.f32 %v1118_v42, %v1950_v17 }
 0x2f4   : > { %v1149_v45 = vadd.f32 %v1148_v39, %v1147_v35  ;;  %v1161_v47 = vadd.f32 %v1160_v41, %v1159_v11  ;;  %v1180_v10 = vsel %vm721_vm0, %v1142_v30, 0.0 }
 0x2f5   : > { %v1157_v40 = vrot.slane %v1156_v43, 1  ;;  %v1169_v49 = vrot.slane %v1168_v32, 2  ;;  %v1181_v50 = vrot.slane %v1180_v10, 4  ;;  %v1173_v44 = vsel %vm721_vm0, %v1141_v12, 0.0 }
 0x2f6   : > { %v1150_v51 = vrot.slane %v1149_v45, 1  ;;  %v1162_v52 = vrot.slane %v1161_v47, 2  ;;  %v1174_v54 = vrot.slane %v1173_v44, 4 }
 0x2f7   : > { %v1158_v56 = vadd.f32 %v1157_v40, %v1156_v43  ;;  %v1170_v19 = vadd.f32 %v1169_v49, %v1168_v32  ;;  %v1182_v57 = vadd.f32 %v1181_v50, %v1180_v10  ;;  %v1597_v58 = vpop.f32.mrb[18].mxu0 }
 0x2f8   : > { %v1151_v59 = vadd.f32 %v1150_v51, %v1149_v45  ;;  %v1163_v60 = vadd.f32 %v1162_v52, %v1161_v47  ;;  %v1175_v17 = vadd.f32 %v1174_v54, %v1173_v44  ;;  %v1144_v61 = vmul.f32 %v1597_v58, %v1952_v18  ;;  %v1128_v62 = vpop.f32.mrb[19].mxu0  ;;  %v1469_v44 = vld [vmem:[%s2103_s6] ss:$0 sm:$0xff] }
 0x2f9   : > { %v1202_v0 = vpack.c.bf16 %v1158_v56, %v1158_v56  ;;  %v1171_v1 = vrot.slane %v1170_v19, 1  ;;  %v1183_v3 = vrot.slane %v1182_v57, 2  ;;  %v1143_v4 = vmul.f32 %v1948_v16, %v1128_v62 }
 0x2fa   : > { %v1201_v6 = vpack.c.bf16 %v1151_v59, %v1151_v59  ;;  %v1164_v7 = vrot.slane %v1163_v60, 1  ;;  %v1176_v8 = vrot.slane %v1175_v17, 2  ;;  %v1194_v46 = vsel %vm721_vm0, %v1144_v61, 0.0 }
 0x2fb   : > { %v1233_v48 = vunpack.c.l.b16 %v1202_v0  ;;  %v1172_v9 = vadd.f32 %v1171_v1, %v1170_v19  ;;  %v1184_v20 = vadd.f32 %v1183_v3, %v1182_v57  ;;  %v1195_v21 = vrot.slane %v1194_v46, 4 }
 0x2fc   : > { %v1232_v55 = vunpack.c.l.b16 %v1201_v6  ;;  %v1165_v53 = vadd.f32 %v1164_v7, %v1163_v60  ;;  %v1177_v63 = vadd.f32 %v1176_v8, %v1175_v17  ;;  %v1187_v18 = vsel %vm721_vm0, %v1143_v4, 0.0 }
 0x2fd   : > { %v1204_v2 = vpack.c.bf16 %v1172_v9, %v1172_v9  ;;  %v1185_v22 = vrot.slane %v1184_v20, 1  ;;  %v1196_v23 = vadd.f32 %v1195_v21, %v1194_v46  ;;  %v1188_v25 = vrot.slane %v1187_v18, 4 }
 0x2fe   : > { %v1241_v16 = vsel %vm1240_vm5, %v1233_v48, %v1232_v55  ;;  %v1203_v27 = vpack.c.bf16 %v1165_v53, %v1165_v53  ;;  %v1178_v24 = vrot.slane %v1177_v63, 1 }
 0x2ff   : > { %v1186_v28 = vadd.f32 %v1185_v22, %v1184_v20  ;;  %v1197_v14 = vrot.slane %v1196_v23, 2  ;;  %v1189_v26 = vadd.f32 %v1188_v25, %v1187_v18  ;;  %v1235_v5 = vunpack.c.l.b16 %v1204_v2 }
 0x300   : > { %v1234_v29 = vunpack.c.l.b16 %v1203_v27  ;;  %v1179_v31 = vadd.f32 %v1178_v24, %v1177_v63 }
 0x301   : > { %v1206_v13 = vpack.c.bf16 %v1186_v28, %v1186_v28  ;;  %v1198_v33 = vadd.f32 %v1197_v14, %v1196_v23  ;;  %v1190_v34 = vrot.slane %v1189_v26, 2 }
 0x302   : > { %v1243_v35 = vsel %vm1242_vm6, %v1234_v29, %v1241_v16  ;;  %v1205_v36 = vpack.c.bf16 %v1179_v31, %v1179_v31 }
 0x303   : > { %v1245_v15 = vsel %vm1244_vm7, %v1235_v5, %v1243_v35  ;;  %v1199_v37 = vrot.slane %v1198_v33, 1  ;;  %v1191_v11 = vadd.f32 %v1190_v34, %v1189_v26  ;;  %v1237_v39 = vunpack.c.l.b16 %v1206_v13 }
 0x304   : > { %v1236_v38 = vunpack.c.l.b16 %v1205_v36 }
 0x305   : > { %v1200_v41 = vadd.f32 %v1199_v37, %v1198_v33  ;;  %v1192_v30 = vrot.slane %v1191_v11, 1 }
 0x306   : > { %v1247_v42 = vsel %vm1246_vm8, %v1236_v38, %v1245_v15 }
 0x307   : > { %v1193_v43 = vadd.f32 %v1192_v30, %v1191_v11  ;;  %v1249_v32 = vsel %vm1248_vm9, %v1237_v39, %v1247_v42  ;;  %v1208_v12 = vpack.c.bf16 %v1200_v41, %v1200_v41 }
 0x309   : > { %v1207_v45 = vpack.c.bf16 %v1193_v43, %v1193_v43  ;;  %v1239_v10 = vunpack.c.l.b16 %v1208_v12 }
 0x30b   : > { %v1238_v47 = vunpack.c.l.b16 %v1207_v45 }
 0x30d   : > { %v1251_v40 = vsel %vm1250_vm10, %v1238_v47, %v1249_v32 }
 0x30e   : > { %v1253_v49 = vsel %vm1252_vm11, %v1239_v10, %v1251_v40 }
 0x30f   : > { %v1254_v50 = vpack.c.b16 %v1253_v49, %v1253_v49 }
 0x311   : > { %1607 = vmatmul.mubr.msk.bf16.vlgmr.msra.gmra.mrb[16].mxu1 %vm721_vm0, %v1254_v50 }
 0x3e4   : > { %v1316_v51 = vpop.f32.mrb[16].mxu1 }
 0x3e5   : > { %v1317_v52 = vadd.f32 %v1469_v44, %v1316_v51  ;;  %v1608_v54 = vpop.f32.mrb[17].mxu1 }
 0x3e6   : > { %v1319_v56 = vpop.f32.mrb[18].mxu1 }
 0x3e7   : > { %v1609_v19 = vpop.f32.mrb[19].mxu1  ;;  %1322 = vst.msk [vmem:[%s285_s20] sm:$0xff] %vm2108_vm12, %v1317_v52 }
 0x3e8   : > { %1728 = shalt.err (!%p1725_p4)
}
 0x3e9   : > { %s1729_s15 = scalar_lea.hbm %s2054_s29, 128  ;;  %s1733_s18 = scalar_lea.hbm %s2104_s7, 256 }
 0x3ea   : > { %p1730_p7 = scmp.ne.s32.totalorder %s2054_s29, %s1729_s15  ;;  %p1734_p10 = scmp.lt.u32.totalorder %s2054_s29, %s2104_s7 }
 0x3eb   : > { %p1735_p11 = scmp.lt.u32.totalorder %s1733_s18, %s1729_s15  ;;  %p1737_p13 = scmp.lt.u32.totalorder %s1729_s15, %s2054_s29 }
 0x3ec   : > { %p1731_p8 = pnand %p1730_p7, %p1862_p5 }
 0x3ed   : > { %p1736_p12 = por %p1735_p11, %p1734_p10 }
 0x3ee   : > { %p1732_p9 = pneg %p1731_p8 }
 0x3ef   : > { %p1738_p0 = por %p1737_p13, %p1736_p12 }
 0x3f1   : > { %p1739_p1 = pnand %p1738_p0, %p1732_p9 }
 0x3f3   : > { %1742 = shalt.err (!%p1739_p1)
}
 0x3f4   : > { %1626 = dma.vmem_to_hbm [thread:$0]  (%p1862_p5), %s2056_s21, 128, %s2054_s29, %s1324_s28  }
 0x3f5 PF: > { %p1632_p2 = scmp.ge.s32.totalorder %s1777_s27, 2  ;;  %s1349_s22 = sand.u32 1, %s1765_s24  }
 0x3f6   : > { %s1350_s23 = scalar_lea.sflag [#allocation3], %s1349_s22 }
 0x3f7   : > { %p1629_p3 = pnand %p1632_p2, %p1866_p6 }
 0x3f9   : > { %1760 = dma.done.wait (!%p1629_p3), %s1350_s23, 128  }
 0x3fa   : > { %1762 = vsyncadd (!%p1629_p3), %s1350_s23, 4294967168  ;;  %p17_p4 = scmp.ge.s32.totalorder %s1849_s30, 4   ;;  %s2109_s24 = smov %s1769_s25 }
 0x3fb   : > { %s2110_s25 = smov %s1773_s26  ;;  %s2111_s26 = smov %s1860_s10 }
 0x3fc   : > { %s2112_s27 = smov %s1849_s30  ;;  %19 = sbr.rel (!%p17_p4) target bundleno = 3 (0x3), region = 86 }
 0x403   :  { %1355 = vsyncpa [#allocation3], 1 }
 0x404   :  { %1357 = vsyncpa [#allocation3 + $0x1], 1 }

</bundles_post_ra>
